<compile_context>
chip_gen: v6e
topology: v6e:2x2x1
jax: 0.10.0
libtpu: 0.0.40
codegen_flags: <defaults>
</compile_context>

<pallas_src>
import jax
import jax.numpy as jnp
from jax import lax
from jax.experimental import pallas as pl
from jax.experimental.pallas import tpu as pltpu


def _round_up(x, m):
    return ((x + m - 1) // m) * m


def _cdiv(a, b):
    return (a + b - 1) // b


def _patch_embed_kernel(p_ref, wf_ref, bf_ref, o_ref):
    # Single fused matmul on the MXU: (TM, K) @ (K, D2), f32 accumulation,
    # plus one resident (1, D2) fused-bias add.
    acc = jnp.dot(p_ref[...], wf_ref[...], preferred_element_type=jnp.float32)
    o_ref[...] = (acc + bf_ref[...]).astype(o_ref.dtype)
    # TODO(synk): training-mode dropout (pltpu.prng_* masking) not implemented;
    # eval-mode dropout is the identity, which is what we reproduce here.


def _im2col_nchw(img, patch_size, stride):
    """Vectorized patch extraction; each row flattened in (c, kh, kw) order.

    Uses patch_size**2 strided slices (independent of the output grid size).
    Called on a bf16 image so the 4x-expanded patch matrix written to HBM is
    half the bytes of the previous f32 version.
    """
    B, C, H, W = img.shape
    oh = (H - patch_size) // stride + 1
    ow = (W - patch_size) // stride + 1
    taps = []
    for kh in range(patch_size):
        for kw in range(patch_size):
            taps.append(lax.slice(
                img,
                start_indices=(0, 0, kh, kw),
                limit_indices=(B, C, kh + (oh - 1) * stride + 1,
                               kw + (ow - 1) * stride + 1),
                strides=(1, 1, stride, stride)))           # (B, C, oh, ow)
    x = jnp.stack(taps, axis=0).reshape(patch_size, patch_size, B, C, oh, ow)
    # -> (B, oh, ow, C, kh, kw): output grid row-major, (c, kh, kw) per patch,
    # matching PyTorch's x.flatten(2).transpose(2, 1) and OIHW weight layout.
    x = x.transpose(2, 4, 5, 3, 0, 1)
    return x.reshape(B, oh * ow, C * patch_size * patch_size)
    # TODO(synk): the remaining HBM round trip of the patch matrix could be
    # removed with an in-kernel gather (img via pl.BlockSpec(memory_space=
    # pl.ANY) + manual pltpu.make_async_copy of strided row bands), or by
    # allow_input_fusion on the patches operand; both left out here because
    # the overlapping stride<patch lane/sublane relayout inside the kernel is
    # not a robust lowering for small W, and the gather chain is not
    # elementwise-fusible.


def fuse_patch_embed_params(params, patch_size, compute_dtype=jnp.bfloat16):
    """One-time (model-load) fusion of Conv2d + Linear into a single matmul.

      (x @ Wc^T + bc) @ Wl^T + bl  ==  x @ (Wc^T @ Wl^T) + (bc @ Wl^T + bl)

    Returns {"wf": (K, D2) compute_dtype, "bf": (1, D2) f32}.
    """
    w_conv = params["w_conv"].astype(jnp.float32)   # (D1, C, p, p)  PyTorch OIHW
    b_conv = params["b_conv"].astype(jnp.float32)   # (D1,)
    w_lin = params["w_lin"].astype(jnp.float32)     # (D2, D1)       PyTorch Linear
    b_lin = params["b_lin"].astype(jnp.float32)     # (D2,)
    D1 = w_conv.shape[0]
    K = w_conv.shape[1] * patch_size * patch_size
    w1 = w_conv.reshape(D1, K).T                    # (K, D1)
    w2 = w_lin.T                                    # (D1, D2)
    wf = (w1 @ w2).astype(compute_dtype)            # (K, D2)
    bf = (b_conv @ w2 + b_lin).reshape(1, -1)       # (1, D2) f32
    return {"wf": wf, "bf": bf}


def patch_and_pos_embedding(img, fused, patch_size, stride=4,
                            compute_dtype=jnp.bfloat16,
                            out_dtype=jnp.float32):
    """img: (B, C, H, W) float32, fused: from fuse_patch_embed_params.

    Returns (B, N, embed_dim) in out_dtype (pass bf16 if the consumer takes
    bf16 to halve output writeback).
    """
    wf = fused["wf"]                               # (K, D2) compute_dtype
    bf = fused["bf"]                               # (1, D2) f32
    K, D2 = wf.shape
    B, C, H, W = img.shape
    assert K == C * patch_size * patch_size

    # --- bf16 im2col (cast BEFORE extraction -> half the intermediate bytes).
    patches = _im2col_nchw(img.astype(compute_dtype), patch_size, stride)
    N = patches.shape[1]
    M = B * N

    in_bytes = jnp.dtype(compute_dtype).itemsize
    out_bytes = jnp.dtype(out_dtype).itemsize

    # --- VMEM accounting: resident fused weight + bias occupy 2 buffers each
    # (Pallas double-buffers even constant-index operands); budget the
    # streamed (in + out) blocks around them, inside the 32 MiB scoped default
    # of every generation (v7x has only 64 MiB physical).
    fixed_bytes = 2 * K * D2 * in_bytes + 2 * 8 * 128 * 4
    block_budget = max(2 * 1024 * 1024, 24 * 1024 * 1024 - fixed_bytes)
    per_row_bytes = 2 * (K * in_bytes + D2 * out_bytes)    # 2x = double buffered
    TM = (block_budget // per_row_bytes) // 16 * 16
    TM = max(16, min(512, TM))          # v6e: 512-row tiles already ~HBM roofline
    # v7x: keep >= 8 grid steps (>= 4 blocks per TensorCore) when M allows it
    # so megacore sharding + the double-buffer pipeline have work to overlap.
    TM = min(TM, max(128, _round_up(_cdiv(M, 8), 16)))
    TM = min(TM, _round_up(M, 16))      # tiny-M case, bf16 sublane pack = 16

    M_pad = _round_up(M, TM)
    p2d = patches.reshape(M, K)
    if M_pad != M:
        # Tiny tail pad; XLA fuses it into the im2col producer in practice.
        p2d = jnp.pad(p2d, ((0, M_pad - M), (0, 0)))

    resident_bytes = fixed_bytes + TM * per_row_bytes
    vmem_limit = int(min(64 * 1024 * 1024,
                         max(8 * 1024 * 1024, 2 * resident_bytes)))

    cost = pl.CostEstimate(
        flops=2 * M_pad * K * D2,
        transcendentals=0,
        bytes_accessed=(M_pad * K * in_bytes + K * D2 * in_bytes
                        + D2 * 4 + M_pad * D2 * out_bytes),
    )

    out = pl.pallas_call(
        _patch_embed_kernel,
        out_shape=jax.ShapeDtypeStruct((M_pad, D2), out_dtype),
        grid=(M_pad // TM,),
        in_specs=[
            pl.BlockSpec((TM, K), lambda i: (i, 0)),    # streamed, pipelined
            pl.BlockSpec((K, D2), lambda i: (0, 0)),    # resident fused weight
            pl.BlockSpec((1, D2), lambda i: (0, 0)),    # resident fused bias
        ],
        out_specs=pl.BlockSpec((TM, D2), lambda i: (i, 0)),
        compiler_params=pltpu.CompilerParams(
            dimension_semantics=("parallel",),          # megacore-shard M (v7x)
            vmem_limit_bytes=vmem_limit,
        ),
        cost_estimate=cost,
    )(p2d, wf, bf)

    return out[:M].reshape(B, N, D2)


def _reference(img, params, patch_size, stride=4):
    """Plain-JAX f32 reference replicating the PyTorch forward (eval mode)."""
    x = lax.conv_general_dilated(
        img, params["w_conv"], window_strides=(stride, stride), padding="VALID",
        dimension_numbers=("NCHW", "OIHW", "NCHW"))
    x = x + params["b_conv"][None, :, None, None]
    B, Co, oh, ow = x.shape
    x = x.reshape(B, Co, oh * ow).transpose(0, 2, 1)       # flatten(2).transpose(2,1)
    x = jnp.einsum("bnk,dk->bnd", x, params["w_lin"]) + params["b_lin"]
    return x                                               # dropout == identity (eval)


if __name__ == "__main__":
    # Small, module-consistent config (stride=4 is hardcoded in the module).
    img_size, patch_size, in_channels, embed_dim = 16, 8, 4, 32
    batch = 2
    patch_dim = patch_size * patch_size * in_channels      # 256
    num_patches = int((img_size / patch_size) ** 2)        # per __init__ (unused in fwd)

    key = jax.random.PRNGKey(0)
    k_img, k_wc, k_bc, k_wl, k_bl, k_cls, k_pos = jax.random.split(key, 7)

    img = jax.random.normal(k_img, (batch, in_channels, img_size, img_size), jnp.float32)

    params = {
        "w_conv": jax.random.normal(k_wc, (patch_dim, in_channels, patch_size, patch_size),
                                    jnp.float32) * 0.05,
        "b_conv": jax.random.normal(k_bc, (patch_dim,), jnp.float32) * 0.05,
        "w_lin": jax.random.normal(k_wl, (embed_dim, patch_dim), jnp.float32) * 0.05,
        "b_lin": jax.random.normal(k_bl, (embed_dim,), jnp.float32) * 0.05,
        # Present in __init__ but never used in forward:
        "cls_token": jax.random.normal(k_cls, (1, 1, embed_dim), jnp.float32),
        "pos_embedding": jax.random.normal(k_pos, (1, num_patches + 1, embed_dim), jnp.float32),
    }

    # One-time weight fusion at "model load" (off the per-call critical path).
    fused = jax.tree_util.tree_map(
        jax.block_until_ready, fuse_patch_embed_params(params, patch_size))

    fwd = jax.jit(patch_and_pos_embedding,
                  static_argnames=("patch_size", "stride", "compute_dtype", "out_dtype"))
    out = fwd(img, fused, patch_size=patch_size, stride=4)
    out = jax.block_until_ready(out)

    ref = _reference(img, params, patch_size, stride=4)
    assert out.shape == ref.shape, (out.shape, ref.shape)
    # bf16 matmul operands (f32 accumulate) + pre-fused weights => relaxed tol
    # vs the unfused f32 reference.
    assert jnp.allclose(out, ref, rtol=2e-2, atol=2e-2), "mismatch vs reference"

    print("KERNEL_OK")
</pallas_src>

<mosaic_0001>
module attributes {stable_mosaic.version = 11 : i64} {
  func.func @_patch_embed_kernel(%arg0: i32, %arg1: memref<32x256xbf16, #tpu.memory_space<vmem>>, %arg2: memref<256x32xbf16, #tpu.memory_space<vmem>>, %arg3: memref<1x32xf32, #tpu.memory_space<vmem>>, %arg4: memref<32x32xf32, #tpu.memory_space<vmem>>) attributes {dimension_semantics = [#tpu.dimension_semantics<parallel>], iteration_bounds = array<i64: 1>, scalar_prefetch = 0 : i64, scratch_operands = 0 : i64, tpu.core_type = #tpu.core_type<tc>, window_params = [{transform_indices = @transform_0, window_bounds = array<i64: 32, 256>}, {pipeline_mode = #tpu.pipeline_mode<synchronous>, transform_indices = @transform_1, window_bounds = array<i64: 256, 32>}, {pipeline_mode = #tpu.pipeline_mode<synchronous>, transform_indices = @transform_2, window_bounds = array<i64: 1, 32>}, {transform_indices = @transform_3, window_bounds = array<i64: 32, 32>}]} {
    %c0 = arith.constant 0 : index
    %c0_0 = arith.constant 0 : index
    %0 = vector.load %arg1[%c0, %c0_0] : memref<32x256xbf16, #tpu.memory_space<vmem>>, vector<32x256xbf16>
    %c0_1 = arith.constant 0 : index
    %c0_2 = arith.constant 0 : index
    %1 = vector.load %arg2[%c0_1, %c0_2] : memref<256x32xbf16, #tpu.memory_space<vmem>>, vector<256x32xbf16>
    %cst = arith.constant dense<0.000000e+00> : vector<32x32xf32>
    %2 = tpu.matmul %0, %1, %cst {dimension_numbers = #tpu.dot_dimension_numbers<[1], [0], [0], [1], [0, 0, 1, 1], [], []>} : vector<32x256xbf16>, vector<256x32xbf16>, vector<32x32xf32> -> vector<32x32xf32>
    %c0_3 = arith.constant 0 : index
    %c0_4 = arith.constant 0 : index
    %3 = vector.load %arg3[%c0_3, %c0_4] : memref<1x32xf32, #tpu.memory_space<vmem>>, vector<1x32xf32>
    %4 = vector.broadcast %3 : vector<1x32xf32> to vector<32x32xf32>
    %5 = arith.addf %2, %4 : vector<32x32xf32>
    %c0_5 = arith.constant 0 : index
    %c0_6 = arith.constant 0 : index
    %6 = vector.load %arg4[%c0_5, %c0_6] : memref<32x32xf32, #tpu.memory_space<vmem>>, vector<32x32xf32>
    tpu.vector_store %arg4[%c0_5, %c0_6], %5 {strides = array<i32>} : memref<32x32xf32, #tpu.memory_space<vmem>>, vector<32x32xf32>,
    return
  }
  func.func @transform_0(%arg0: i32) -> (i32, i32) {
    %c0_i32 = arith.constant 0 : i32
    %c0_i32_0 = arith.constant 0 : i32
    return %arg0, %c0_i32 : i32, i32
  }
  func.func @transform_1(%arg0: i32) -> (i32, i32) {
    %c0_i32 = arith.constant 0 : i32
    %c0_i32_0 = arith.constant 0 : i32
    %c0_i32_1 = arith.constant 0 : i32
    return %c0_i32, %c0_i32_0 : i32, i32
  }
  func.func @transform_2(%arg0: i32) -> (i32, i32) {
    %c0_i32 = arith.constant 0 : i32
    %c0_i32_0 = arith.constant 0 : i32
    %c0_i32_1 = arith.constant 0 : i32
    return %c0_i32, %c0_i32_0 : i32, i32
  }
  func.func @transform_3(%arg0: i32) -> (i32, i32) {
    %c0_i32 = arith.constant 0 : i32
    %c0_i32_0 = arith.constant 0 : i32
    return %arg0, %c0_i32 : i32, i32
  }
}

</mosaic_0001>

<bundles_post_ra>
// kernel: patch_and_pos_embedding.1
= control target key start
LH: loop header
LB: loop body
LE: loop exit
PB: predicated region body
PF: predicated region fallthrough
CT: control target
= control target key end

     0   :  { %vm223_vm0 = vcmask 261120   ;;  %s414_s1 = inlined_call_operand.vmem [shape: bf16[256,32], index: 1, kind: input, shape index: {}]   ;;  %s415_s0 = inlined_call_operand.vmem [shape: bf16[32,256], index: 0, kind: input, shape index: {}]   ;;  %s416_s2 = inlined_call_operand.vmem [shape: f32[1,32], index: 2, kind: input, shape index: {}]   ;;  %s417_s3 = inlined_call_operand.vmem [shape: f32[32,32], index: 3, kind: output, shape index: {}]  }
   0x1   :  { %v297_v0 = vld [vmem:[%s414_s1 + $0x78] sm:$0xff]   ;;  %v299_v2 = vld [vmem:[%s414_s1 + $0x70] sm:$0xff]   ;;  %v301_v4 = vld [vmem:[%s414_s1 + $0x68] sm:$0xff]  }
   0x2   :  { %v298_v1 = vld [vmem:[%s414_s1 + $0x38] sm:$0xff]   ;;  %253 = vmatprep.subr.bf16.mxu0 %v297_v0  ;;  %281 = vmatprep.subr.bf16.mxu1 %v297_v0  ;;  %v300_v3 = vld [vmem:[%s414_s1 + $0x30] sm:$0xff]   ;;  %v302_v5 = vld [vmem:[%s414_s1 + $0x28] sm:$0xff]  }
   0x3   :  { %254 = vmatpush3.bf16.msra.mxu0 %v298_v1  ;;  %289 = vmatpush3.bf16.msra.mxu1 %v298_v1  ;;  %v303_v6 = vld [vmem:[%s414_s1 + $0x60] sm:$0xff]   ;;  %v305_v8 = vld [vmem:[%s414_s1 + $0x58] sm:$0xff]   ;;  %v307_v10 = vld [vmem:[%s414_s1 + $0x50] sm:$0xff]  }
   0x4   :  { %255 = vmatprep.subr.bf16.mxu0 %v299_v2  ;;  %282 = vmatprep.subr.bf16.mxu1 %v299_v2  ;;  %v304_v7 = vld [vmem:[%s414_s1 + $0x20] sm:$0xff]   ;;  %v306_v9 = vld [vmem:[%s414_s1 + $0x18] sm:$0xff]   ;;  %v308_v13 = vld [vmem:[%s414_s1 + $0x10] sm:$0xff]  }
   0x5   :  { %v315_v11 = vld [vmem:[%s415_s0 + $0x4] ss:$8 sps:$4 sm:$0xff]   ;;  %v318_v12 = vld [vmem:[%s415_s0 + $0x14] ss:$8 sps:$4 sm:$0xff]   ;;  %v313_v18 = vld [vmem:[%s415_s0] ss:$8 sps:$4 sm:$0xff]  }
   0x6   :  { %v309_v14 = vld [vmem:[%s414_s1 + $0x48] sm:$0xff]   ;;  %206 = vmatprep.mubr.bf16.mxu0 %v315_v11  ;;  %214 = vmatprep.mubr.bf16.mxu1 %v318_v12  ;;  %v311_v16 = vld [vmem:[%s414_s1 + $0x40] sm:$0xff]   ;;  %v316_v19 = vld [vmem:[%s415_s0 + $0x10] ss:$8 sps:$4 sm:$0xff]  }
   0x7   :  { %256 = vmatpush3.bf16.msra.mxu0 %v300_v3  ;;  %290 = vmatpush3.bf16.msra.mxu1 %v300_v3  ;;  %v310_v15 = vld [vmem:[%s414_s1 + $0x8] sm:$0xff]   ;;  %v312_v17 = vld [vmem:[%s414_s1] sm:$0xff]  }
   0x8   :  { %257 = vmatprep.subr.bf16.mxu0 %v301_v4  ;;  %283 = vmatprep.subr.bf16.mxu1 %v301_v4  ;;  %v232_v22 = vld [vmem:[%s416_s2] ss:$0 sm:$0xff] }
   0xb   :  { %258 = vmatpush3.bf16.msra.mxu0 %v302_v5  ;;  %291 = vmatpush3.bf16.msra.mxu1 %v302_v5 }
   0xc   :  { %259 = vmatprep.subr.bf16.mxu0 %v303_v6  ;;  %284 = vmatprep.subr.bf16.mxu1 %v303_v6 }
   0xf   :  { %260 = vmatpush3.bf16.msra.mxu0 %v304_v7  ;;  %292 = vmatpush3.bf16.msra.mxu1 %v304_v7 }
  0x10   :  { %261 = vmatprep.subr.bf16.mxu0 %v305_v8  ;;  %285 = vmatprep.subr.bf16.mxu1 %v305_v8 }
  0x13   :  { %262 = vmatpush3.bf16.msra.mxu0 %v306_v9  ;;  %293 = vmatpush3.bf16.msra.mxu1 %v306_v9 }
  0x14   :  { %263 = vmatprep.subr.bf16.mxu0 %v307_v10  ;;  %286 = vmatprep.subr.bf16.mxu1 %v307_v10 }
  0x17   :  { %264 = vmatpush3.bf16.msra.mxu0 %v308_v13  ;;  %294 = vmatpush3.bf16.msra.mxu1 %v308_v13 }
  0x18   :  { %265 = vmatprep.subr.bf16.mxu0 %v309_v14  ;;  %287 = vmatprep.subr.bf16.mxu1 %v309_v14 }
  0x1b   :  { %266 = vmatpush3.bf16.msra.mxu0 %v310_v15  ;;  %295 = vmatpush3.bf16.msra.mxu1 %v310_v15 }
  0x1c   :  { %267 = vmatprep.subr.bf16.mxu0 %v311_v16  ;;  %288 = vmatprep.subr.bf16.mxu1 %v311_v16 }
  0x1f   :  { %268 = vmatpush3.bf16.msra.mxu0 %v312_v17  ;;  %296 = vmatpush3.bf16.msra.mxu1 %v312_v17 }
  0x22   :  { %207 = vmatmul.mubr.bf16.vlgmr.msra.gmra.mxu0 %v313_v18  ;;  %215 = vmatmul.mubr.bf16.vlgmr.msra.gmra.mxu1 %v316_v19 }
  0xe2   :  { %v269_v20 = vpop.f32.mrf.mxu0  ;;  %v275_v21 = vpop.f32.mrf.mxu1 }
  0xe4   :  { %v270_v23 = vpop.f32.mrf.mxu0  ;;  %v276_v24 = vpop.f32.mrf.mxu1 }
  0xe5   :  { %v271_v25 = vadd.f32 %v270_v23, %v269_v20  ;;  %v277_v26 = vadd.f32 %v276_v24, %v275_v21 }
  0xe6   :  { %v272_v27 = vpop.f32.mrf.mxu0  ;;  %v278_v28 = vpop.f32.mrf.mxu1 }
  0xe7   :  { %v209_v29 = vadd.f32 %v271_v25, %v232_v22  ;;  %v217_v30 = vadd.f32 %v277_v26, %v232_v22 }
  0xe8   :  { %v273_v31 = vpop.f32.mrf.mxu0  ;;  %v279_v32 = vpop.f32.mrf.mxu1 }
  0xe9   :  { %224 = vst.msk [vmem:[%s417_s3] sm:$0xff] %vm223_vm0, %v209_v29  ;;  %226 = vst.msk [vmem:[%s417_s3 + $0x10] sm:$0xff] %vm223_vm0, %v217_v30  ;;  %v274_v33 = vadd.f32 %v273_v31, %v272_v27  ;;  %v280_v34 = vadd.f32 %v279_v32, %v278_v28 }
  0xeb   :  { %v212_v35 = vadd.f32 %v274_v33, %v232_v22  ;;  %v220_v36 = vadd.f32 %v280_v34, %v232_v22 }
  0xed   :  { %225 = vst.msk [vmem:[%s417_s3 + $0x8] sm:$0xff] %vm223_vm0, %v212_v35  ;;  %227 = vst.msk [vmem:[%s417_s3 + $0x18] sm:$0xff] %vm223_vm0, %v220_v36 }

</bundles_post_ra>
